<compile_context>
chip_gen: v7x
topology: tpu7x:2x2x1
jax: 0.10.0
libtpu: 0.0.40
codegen_flags: <defaults>
</compile_context>

<pallas_src>
import warnings

import jax
import jax.numpy as jnp
from jax.experimental import pallas as pl
from jax.experimental.pallas import tpu as pltpu


def _make_patching_kernel(patch_len, stride, n_patches):
    def kernel(x_ref, o_ref):
        x = x_ref[...]  # [TILE_R, L]
        if stride == patch_len:
            # Non-overlapping patches: the flattened output is just the first
            # n_patches*patch_len columns of the input (contiguous copy).
            o_ref[...] = x[:, : n_patches * patch_len]
        else:
            # Overlapping / gapped patches: gather with static slices and emit
            # a single lane-dense store.
            pieces = [
                x[:, p * stride : p * stride + patch_len]
                for p in range(n_patches)
            ]
            o_ref[...] = jnp.concatenate(pieces, axis=1)

    return kernel


def patching(x, patch_len, stride, *, tile_rows=None):
    """Pallas equivalent of Patching.forward.

    x: [..., L]  ->  [..., n_patches, patch_len]
    """
    if stride != patch_len:
        warnings.warn(
            "Stride and patch length are not equal. "
            "This may lead to unexpected behavior."
        )

    *lead, L = x.shape
    n_patches = (L - patch_len) // stride + 1
    assert n_patches >= 1, "patch_len larger than sequence length"
    out_flat = n_patches * patch_len

    R = 1
    for d in lead:
        R *= d
    x2 = x.reshape(R, L)

    itemsize = jnp.dtype(x.dtype).itemsize
    if tile_rows is None:
        # Largest row tile (multiple of 8, <= 1024) whose double-buffered
        # input+output tiles fit a conservative ~16 MiB VMEM budget
        # (safe under v7x's 64 MiB / 32 MiB default scoped limit).
        budget = 16 * 1024 * 1024
        per_row = 2 * (L + out_flat) * itemsize
        tile_rows = max(8, min(1024, (budget // max(per_row, 1)) // 8 * 8))
    tile_rows = min(tile_rows, R)  # block equal to full dim is always legal

    grid = (pl.cdiv(R, tile_rows),)
    kernel = _make_patching_kernel(patch_len, stride, n_patches)

    cost = pl.CostEstimate(
        flops=0,
        transcendentals=0,
        bytes_accessed=(R * L + R * out_flat) * itemsize,
    )

    out = pl.pallas_call(
        kernel,
        out_shape=jax.ShapeDtypeStruct((R, out_flat), x.dtype),
        grid=grid,
        in_specs=[pl.BlockSpec((tile_rows, L), lambda i: (i, 0))],
        out_specs=pl.BlockSpec((tile_rows, out_flat), lambda i: (i, 0)),
        compiler_params=pltpu.CompilerParams(
            dimension_semantics=("parallel",),
        ),
        cost_estimate=cost,
    )(x2)

    return out.reshape(*lead, n_patches, patch_len)


if __name__ == "__main__":
    # Small shapes consistent with the module: [B, C, L] time series.
    B, C, L = 2, 4, 16
    patch_len, stride = 8, 8

    key = jax.random.PRNGKey(0)
    x = jax.random.normal(key, (B, C, L), dtype=jnp.float32)

    # --- non-overlapping case (stride == patch_len, the intended use) ---
    out = jax.block_until_ready(patching(x, patch_len, stride))

    n_patches = (L - patch_len) // stride + 1
    ref = jnp.stack(
        [x[..., p * stride : p * stride + patch_len] for p in range(n_patches)],
        axis=-2,
    )
    assert out.shape == (B, C, n_patches, patch_len)
    assert jnp.allclose(out, ref), "mismatch vs reference (stride == patch_len)"

    # --- overlapping case (stride != patch_len) exercises the slice path ---
    patch_len2, stride2 = 8, 4
    with warnings.catch_warnings():
        warnings.simplefilter("ignore")
        out2 = jax.block_until_ready(patching(x, patch_len2, stride2))
    n2 = (L - patch_len2) // stride2 + 1
    ref2 = jnp.stack(
        [x[..., p * stride2 : p * stride2 + patch_len2] for p in range(n2)],
        axis=-2,
    )
    assert out2.shape == (B, C, n2, patch_len2)
    assert jnp.allclose(out2, ref2), "mismatch vs reference (stride != patch_len)"

    print("KERNEL_OK")
</pallas_src>

<mosaic_0001>
module attributes {stable_mosaic.version = 11 : i64} {
  func.func @kernel(%arg0: i32, %arg1: memref<8x16xf32, #tpu.memory_space<vmem>>, %arg2: memref<8x16xf32, #tpu.memory_space<vmem>>) attributes {dimension_semantics = [#tpu.dimension_semantics<parallel>], iteration_bounds = array<i64: 1>, scalar_prefetch = 0 : i64, scratch_operands = 0 : i64, tpu.core_type = #tpu.core_type<tc>, window_params = [{transform_indices = @transform_0, window_bounds = array<i64: 8, 16>}, {transform_indices = @transform_1, window_bounds = array<i64: 8, 16>}]} {
    %c0 = arith.constant 0 : index
    %c0_0 = arith.constant 0 : index
    %0 = vector.load %arg1[%c0, %c0_0] : memref<8x16xf32, #tpu.memory_space<vmem>>, vector<8x16xf32>
    %c0_1 = arith.constant 0 : index
    %c0_2 = arith.constant 0 : index
    %1 = vector.load %arg2[%c0_1, %c0_2] : memref<8x16xf32, #tpu.memory_space<vmem>>, vector<8x16xf32>
    tpu.vector_store %arg2[%c0_1, %c0_2], %0 {strides = array<i32>} : memref<8x16xf32, #tpu.memory_space<vmem>>, vector<8x16xf32>,
    return
  }
  func.func @transform_0(%arg0: i32) -> (i32, i32) {
    %c0_i32 = arith.constant 0 : i32
    %c0_i32_0 = arith.constant 0 : i32
    return %arg0, %c0_i32 : i32, i32
  }
  func.func @transform_1(%arg0: i32) -> (i32, i32) {
    %c0_i32 = arith.constant 0 : i32
    %c0_i32_0 = arith.constant 0 : i32
    return %arg0, %c0_i32 : i32, i32
  }
}

</mosaic_0001>

<bundles_post_ra>
// kernel: tpu_custom_call.1
= control target key start
LH: loop header
LB: loop body
LE: loop exit
PB: predicated region body
PF: predicated region fallthrough
CT: control target
= control target key end

     0   :  { %6 = vsyncpa [#allocation3], 0  ;;  %s125_s0 = inlined_call_operand.hbm [shape: f32[8,16], index: 0, kind: input, shape index: {}]   ;;  %s126_s1 = inlined_call_operand.hbm [shape: f32[8,16], index: 1, kind: output, shape index: {}]  }
   0x1   :  { %7 = vsyncpa [#allocation4], 0  ;;  %s89_s6 = smov [#allocation2]   ;;  %s41_s10 = scalar_lea.hbm %s125_s0, 128 }
   0x2   :  { %s14_s7 = sshll.u32 %s89_s6, 4  ;;  %p42_p0 = scmp.ne.s32.totalorder %s125_s0, %s41_s10  ;;  %s15_s7 = int_to_ptr.vmem [resolvable:$true] %s14_s7 }
   0x3   :  { %p45_p1 = scmp.lt.u32.totalorder %s41_s10, %s125_s0 }
   0x5   :  { %p47_p2 = pnand %p45_p1, %p42_p0 }
   0x7   :  { %50 = shalt.err (!%p47_p2)
}
   0x8   :  { %s51_s15 = scalar_lea.vmem %s15_s7, 128  ;;  %p56_p4 = scmp.lt.s32.totalorder %s15_s7, %s15_s7 }
   0x9   :  { %p52_p3 = scmp.ne.s32.totalorder %s15_s7, %s51_s15  ;;  %p57_p5 = scmp.lt.s32.totalorder %s51_s15, %s51_s15 }
   0xb   :  { %p58_p6 = por %p57_p5, %p56_p4 }
   0xd   :  { %p59_p7 = pnand %p58_p6, %p52_p3 }
   0xf   :  { %62 = shalt.err (!%p59_p7)
}
  0x10   :  { %17 = dma.hbm_to_vmem [thread:$0]  %s125_s0, 128, %s15_s7, [#allocation3]  }
  0x11   :  { %85 = dma.done.wait [#allocation3], 128  }
  0x12   :  { %86 = vsyncadd [#allocation3], 4294967168  ;;  %s90_s18 = smov [#allocation5]   ;;  %vm22_vm0 = vcmask 130048   ;;  %v21_v0 = vld [vmem:[#allocation2] sm:$0xff] }
  0x13   :  { %s30_s19 = sshll.u32 %s90_s18, 4  ;;  %23 = vst.msk [vmem:[#allocation5] sm:$0xff] %vm22_vm0, %v21_v0  ;;  %s31_s19 = int_to_ptr.vmem [resolvable:$true] %s30_s19 }
  0x14   :  { %s63_s20 = scalar_lea.vmem %s31_s19, 128  ;;  %p68_p9 = scmp.lt.s32.totalorder %s31_s19, %s31_s19 }
  0x15   :  { %p64_p8 = scmp.ne.s32.totalorder %s31_s19, %s63_s20  ;;  %p69_p10 = scmp.lt.s32.totalorder %s63_s20, %s63_s20 }
  0x17   :  { %p70_p11 = por %p69_p10, %p68_p9 }
  0x19   :  { %p71_p12 = pnand %p70_p11, %p64_p8 }
  0x1b   :  { %74 = shalt.err (!%p71_p12)
}
  0x1c   :  { %s75_s23 = scalar_lea.hbm %s126_s1, 128 }
  0x1d   :  { %p76_p13 = scmp.ne.s32.totalorder %s126_s1, %s75_s23  ;;  %p79_p0 = scmp.lt.u32.totalorder %s75_s23, %s126_s1 }
  0x1f   :  { %p81_p1 = pnand %p79_p0, %p76_p13 }
  0x21   :  { %84 = shalt.err (!%p81_p1)
}
  0x22   :  { %33 = dma.vmem_to_hbm [thread:$0]  %s31_s19, 128, %s126_s1, [#allocation4]  }
  0x23   :  { %87 = dma.done.wait [#allocation4], 128  }
  0x24   :  { %88 = vsyncadd [#allocation4], 4294967168 }
  0x25   :  { %37 = vsyncpa [#allocation3], 1 }
  0x26   :  { %38 = vsyncpa [#allocation4], 1 }

</bundles_post_ra>
